<compile_context>
chip_gen: v7x
topology: tpu7x:2x2x1
jax: 0.10.0
libtpu: 0.0.40
codegen_flags: <defaults>
</compile_context>

<pallas_src>
import jax
import jax.numpy as jnp
from jax.experimental import pallas as pl
from jax.experimental.pallas import tpu as pltpu


# ------------------------------ helpers --------------------------------------

def _round_up(x, m):
    return ((x + m - 1) // m) * m


_DEFAULT_TM = 256     # row tile for realistic B*S (multiple of 16 for bf16 pack)
_SUBLANE_PACK = 16    # bf16 packs 16 sublanes per vreg
_LANE = 128           # lane width / minimum MXU-friendly multiple


# ----------------------------- Pallas kernel ----------------------------------

def adapter_kernel(x_ref, w1_ref, b1_ref, w2_ref, b2_ref, o_ref):
    """Fused 2-layer MLP adapter for one row-tile of stacked speech frames.

    x_ref : (TM, KD_pad)      bf16
    w1_ref: (KD_pad, H_pad)   bf16   b1_ref: (1, H_pad)  bf16
    w2_ref: (H_pad, P_pad)    bf16   b2_ref: (1, P_pad)  bf16
    o_ref : (TM, P_pad)       bf16
    """
    h = jnp.dot(x_ref[...], w1_ref[...], preferred_element_type=jnp.float32)
    h = h + b1_ref[...].astype(jnp.float32)          # bias + ReLU in f32 (VPU)
    h = jnp.maximum(h, 0.0)
    # bf16 intermediate matches the torch adapter which runs entirely in bf16.
    y = jnp.dot(h.astype(w2_ref.dtype), w2_ref[...],
                preferred_element_type=jnp.float32)
    y = y + b2_ref[...].astype(jnp.float32)
    o_ref[...] = y.astype(o_ref.dtype)


def _adapter_call(xk, w1, b1, w2, b2, *, tm, single_buffer_weights):
    """One pallas_call over padded operands. Shapes are already tile-aligned."""
    rows_pad, KD_pad = xk.shape
    H_pad = w1.shape[1]
    P_pad = w2.shape[1]
    grid = (rows_pad // tm,)

    def resident(shape):
        # Grid-invariant block (weights / biases): stays in VMEM across steps.
        idx = lambda i, _n=len(shape): (0,) * _n
        if single_buffer_weights and hasattr(pl, "Buffered"):
            return pl.BlockSpec(shape, idx, pipeline_mode=pl.Buffered(1))
        return pl.BlockSpec(shape, idx)

    # advisory cost estimate for XLA scheduling around the custom call
    flops = int(2 * rows_pad * (KD_pad * H_pad + H_pad * P_pad))
    bytes_accessed = int(
        xk.size * 2 + w1.size * 2 + b1.size * 2 + w2.size * 2 + b2.size * 2
        + rows_pad * P_pad * 2)

    # VMEM budget: double-buffered x/out tiles, resident weights (1x or 2x),
    # plus f32 intermediates headroom. Only raise the scoped limit when needed;
    # cap well under v7x's 64 MiB physical VMEM.
    wbuf = 1 if single_buffer_weights else 2
    vmem_need = (2 * tm * KD_pad * 2 + 2 * tm * P_pad * 2
                 + wbuf * (KD_pad * H_pad + H_pad + H_pad * P_pad + P_pad) * 2
                 + tm * H_pad * 4 + tm * P_pad * 4)
    cp_kwargs = dict(dimension_semantics=("parallel",))
    if vmem_need > 12 * 1024 * 1024:
        cp_kwargs["vmem_limit_bytes"] = min(int(vmem_need * 2), 48 * 1024 * 1024)

    return pl.pallas_call(
        adapter_kernel,
        out_shape=jax.ShapeDtypeStruct((rows_pad, P_pad), jnp.bfloat16),
        grid_spec=pltpu.PrefetchScalarGridSpec(
            num_scalar_prefetch=0,
            grid=grid,
            in_specs=[
                pl.BlockSpec((tm, KD_pad), lambda i: (i, 0)),  # stacked frames
                resident((KD_pad, H_pad)),                     # W1 (resident)
                resident((1, H_pad)),                          # b1
                resident((H_pad, P_pad)),                      # W2 (resident)
                resident((1, P_pad)),                          # b2
            ],
            out_specs=pl.BlockSpec((tm, P_pad), lambda i: (i, 0)),
        ),
        compiler_params=pltpu.CompilerParams(**cp_kwargs),
        cost_estimate=pl.CostEstimate(flops=flops, transcendentals=0,
                                      bytes_accessed=bytes_accessed),
    )(xk, w1, b1, w2, b2)


def speech_adapter(x, w1, b1, w2, b2, downsample_K, *, tm=_DEFAULT_TM):
    """x: (B, T, D_enc) bf16 features -> (B, T // K, project_dim) bf16."""
    B, T, D = x.shape
    S = T // downsample_K
    KD = downsample_K * D
    H = w1.shape[1]
    P = w2.shape[1]

    # glue: frame stacking (B, T, D) -> (B*S, K*D); tail frames beyond S*K are
    # dropped, matching the torch adapter's reshape-downsample.
    xk = x[:, :S * downsample_K, :].reshape(B * S, KD)
    rows = B * S

    # MXU-friendly zero padding (numerically exact: padded x cols / W1 rows are
    # zero, padded hidden units are ReLU(0)=0 and hit zero rows of W2).
    KD_pad = _round_up(KD, _LANE)          # 160 -> 256 for the toy dims
    H_pad = _round_up(H, _LANE)            # 64  -> 128
    P_pad = _round_up(P, _LANE)            # 256 -> 256 (lane-dense output)

    # Row tile: big for realistic B*S, clamped (multiple of 16) for tiny inputs.
    tm_eff = min(tm, _round_up(rows, _SUBLANE_PACK))
    rows_pad = _round_up(rows, tm_eff)

    xk_p = jnp.pad(xk, ((0, rows_pad - rows), (0, KD_pad - KD)))
    w1_p = jnp.pad(w1, ((0, KD_pad - KD), (0, H_pad - H)))
    b1_p = jnp.pad(b1, ((0, 0), (0, H_pad - H)))
    w2_p = jnp.pad(w2, ((0, H_pad - H), (0, P_pad - P)))
    b2_p = jnp.pad(b2, ((0, 0), (0, P_pad - P)))

    try:
        out = _adapter_call(xk_p, w1_p, b1_p, w2_p, b2_p,
                            tm=tm_eff, single_buffer_weights=True)
    except Exception:
        # pl.Buffered(1) / pipeline_mode unsupported in this jax build: fall
        # back to default double-buffered resident weights (correctness same).
        out = _adapter_call(xk_p, w1_p, b1_p, w2_p, b2_p,
                            tm=tm_eff, single_buffer_weights=False)
    return out[:rows, :P].reshape(B, S, P)


# --------------------------- SLAM_ASR (Pallas) --------------------------------

class SlamASRPallas:
    """JAX/Pallas re-implementation of the SLAM_ASR forward hot path."""

    def __init__(self, key, d_enc=32, downsample_K=5, hidden_dim=64,
                 project_dim=256):
        self.downsample_K = downsample_K
        k1, k2, k3 = jax.random.split(key, 3)
        KD = downsample_K * d_enc
        # deterministic synthetic adapter parameters (bf16, like the torch module)
        self.w1 = (jax.random.normal(k1, (KD, hidden_dim), jnp.float32)
                   * (1.0 / KD) ** 0.5).astype(jnp.bfloat16)
        self.b1 = jnp.zeros((1, hidden_dim), jnp.bfloat16)
        self.w2 = (jax.random.normal(k2, (hidden_dim, project_dim), jnp.float32)
                   * (1.0 / hidden_dim) ** 0.5).astype(jnp.bfloat16)
        self.b2 = jnp.zeros((1, project_dim), jnp.bfloat16)
        # end-of-audio ('#') embedding stand-in for the frozen RWKV embedding row
        self.end_of_audio = (jax.random.normal(k3, (project_dim,), jnp.float32)
                             * 0.02).astype(jnp.bfloat16)

    def forward(self, audio_feats):
        """audio_feats: (B, T, D_enc) bf16 frozen-encoder features.

        Returns (prompt_embed, prompt_mask) — the inputs the external RWKV LM
        would consume in the PyTorch module's forward() (inference branch).
        """
        B, T, _ = audio_feats.shape
        speech_output = speech_adapter(audio_feats, self.w1, self.b1,
                                       self.w2, self.b2, self.downsample_K)
        S = speech_output.shape[1]
        # all-ones mask, like the torch SpeechEncoder output for unpadded audio
        mask = jnp.ones((B, S), jnp.int32)
        # inference branch of _prepare_input_embeds: append end-of-audio embed.
        # Note: the torch module also leaves the mask at length S (no entry for
        # the appended position) — intentionally preserved here.
        eoa = jnp.broadcast_to(self.end_of_audio[None, None, :],
                               (B, 1, speech_output.shape[-1]))
        prompt_embed = jnp.concatenate([speech_output, eoa], axis=1)
        prompt_mask = mask
        # TODO(synk): external HF tokenizer, ragged remove_padding/concatenation
        # of transcription embeddings, and the RWKV language-model forward have
        # no clean Pallas equivalent (external pretrained modules / ragged ops).
        return prompt_embed, prompt_mask


# --------------------------------- main ----------------------------------------

if __name__ == "__main__":
    key = jax.random.PRNGKey(0)
    kp, kx, kx2 = jax.random.split(key, 3)

    B, T, D_ENC = 2, 40, 32          # downsample_K=5 -> S=8 output frames
    model = SlamASRPallas(kp, d_enc=D_ENC, downsample_K=5,
                          hidden_dim=64, project_dim=256)

    def adapter_ref(x, m):
        Bq, Tq, Dq = x.shape
        Sq = Tq // m.downsample_K
        xk = x[:, :Sq * m.downsample_K, :].reshape(
            Bq * Sq, m.downsample_K * Dq).astype(jnp.float32)
        h = jnp.maximum(xk @ m.w1.astype(jnp.float32)
                        + m.b1.astype(jnp.float32), 0.0)
        h = h.astype(jnp.bfloat16).astype(jnp.float32)   # kernel's bf16 interm.
        y = h @ m.w2.astype(jnp.float32) + m.b2.astype(jnp.float32)
        return y.reshape(Bq, Sq, -1)

    audio_feats = jax.random.normal(kx, (B, T, D_ENC),
                                    jnp.float32).astype(jnp.bfloat16)
    prompt_embed, prompt_mask = model.forward(audio_feats)
    jax.block_until_ready(prompt_embed)
    jax.block_until_ready(prompt_mask)

    S = T // 5
    ref = adapter_ref(audio_feats, model)
    got = prompt_embed[:, :S, :].astype(jnp.float32)
    assert prompt_embed.shape == (B, S + 1, 256)
    assert prompt_mask.shape == (B, S)
    assert jnp.max(jnp.abs(got - ref)) < 5e-2, "adapter mismatch vs reference"

    # ragged check: T not a multiple of K, rows not a tile multiple (pad path)
    B2, T2 = 3, 37
    feats2 = jax.random.normal(kx2, (B2, T2, D_ENC),
                               jnp.float32).astype(jnp.bfloat16)
    pe2, pm2 = model.forward(feats2)
    jax.block_until_ready(pe2)
    S2 = T2 // 5
    ref2 = adapter_ref(feats2, model)
    got2 = pe2[:, :S2, :].astype(jnp.float32)
    assert pe2.shape == (B2, S2 + 1, 256)
    assert pm2.shape == (B2, S2)
    assert jnp.max(jnp.abs(got2 - ref2)) < 5e-2, "ragged adapter mismatch"

    print("KERNEL_OK")
</pallas_src>

<mosaic_0001>
module attributes {stable_mosaic.version = 11 : i64} {
  func.func @adapter_kernel(%arg0: i32, %arg1: memref<16x256xbf16, #tpu.memory_space<vmem>>, %arg2: memref<256x128xbf16, #tpu.memory_space<vmem>>, %arg3: memref<1x128xbf16, #tpu.memory_space<vmem>>, %arg4: memref<128x256xbf16, #tpu.memory_space<vmem>>, %arg5: memref<1x256xbf16, #tpu.memory_space<vmem>>, %arg6: memref<16x256xbf16, #tpu.memory_space<vmem>>) attributes {dimension_semantics = [#tpu.dimension_semantics<parallel>], iteration_bounds = array<i64: 1>, scalar_prefetch = 0 : i64, scratch_operands = 0 : i64, tpu.core_type = #tpu.core_type<tc>, window_params = [{transform_indices = @transform_0, window_bounds = array<i64: 16, 256>}, {pipeline_mode = #tpu.pipeline_mode<synchronous>, transform_indices = @transform_1, window_bounds = array<i64: 256, 128>}, {pipeline_mode = #tpu.pipeline_mode<synchronous>, transform_indices = @transform_2, window_bounds = array<i64: 1, 128>}, {pipeline_mode = #tpu.pipeline_mode<synchronous>, transform_indices = @transform_3, window_bounds = array<i64: 128, 256>}, {pipeline_mode = #tpu.pipeline_mode<synchronous>, transform_indices = @transform_4, window_bounds = array<i64: 1, 256>}, {transform_indices = @transform_5, window_bounds = array<i64: 16, 256>}]} {
    %c0 = arith.constant 0 : index
    %c0_0 = arith.constant 0 : index
    %0 = vector.load %arg1[%c0, %c0_0] : memref<16x256xbf16, #tpu.memory_space<vmem>>, vector<16x256xbf16>
    %c0_1 = arith.constant 0 : index
    %c0_2 = arith.constant 0 : index
    %1 = vector.load %arg2[%c0_1, %c0_2] : memref<256x128xbf16, #tpu.memory_space<vmem>>, vector<256x128xbf16>
    %cst = arith.constant dense<0.000000e+00> : vector<16x128xf32>
    %2 = tpu.matmul %0, %1, %cst {dimension_numbers = #tpu.dot_dimension_numbers<[1], [0], [0], [1], [0, 0, 1, 1], [], []>} : vector<16x256xbf16>, vector<256x128xbf16>, vector<16x128xf32> -> vector<16x128xf32>
    %c0_3 = arith.constant 0 : index
    %c0_4 = arith.constant 0 : index
    %3 = vector.load %arg3[%c0_3, %c0_4] : memref<1x128xbf16, #tpu.memory_space<vmem>>, vector<1x128xbf16>
    %4 = arith.extf %3 : vector<1x128xbf16> to vector<1x128xf32>
    %5 = vector.broadcast %4 : vector<1x128xf32> to vector<16x128xf32>
    %6 = arith.addf %2, %5 : vector<16x128xf32>
    %cst_5 = arith.constant 0.000000e+00 : f32
    %7 = vector.broadcast %cst_5 : f32 to vector<16x128xf32>
    %8 = arith.maximumf %6, %7 : vector<16x128xf32>
    %9 = arith.truncf %8 : vector<16x128xf32> to vector<16x128xbf16>
    %c0_6 = arith.constant 0 : index
    %c0_7 = arith.constant 0 : index
    %10 = vector.load %arg4[%c0_6, %c0_7] : memref<128x256xbf16, #tpu.memory_space<vmem>>, vector<128x256xbf16>
    %cst_8 = arith.constant dense<0.000000e+00> : vector<16x256xf32>
    %11 = tpu.matmul %9, %10, %cst_8 {dimension_numbers = #tpu.dot_dimension_numbers<[1], [0], [0], [1], [0, 0, 1, 1], [], []>} : vector<16x128xbf16>, vector<128x256xbf16>, vector<16x256xf32> -> vector<16x256xf32>
    %c0_9 = arith.constant 0 : index
    %c0_10 = arith.constant 0 : index
    %12 = vector.load %arg5[%c0_9, %c0_10] : memref<1x256xbf16, #tpu.memory_space<vmem>>, vector<1x256xbf16>
    %13 = arith.extf %12 : vector<1x256xbf16> to vector<1x256xf32>
    %14 = vector.broadcast %13 : vector<1x256xf32> to vector<16x256xf32>
    %15 = arith.addf %11, %14 : vector<16x256xf32>
    %16 = arith.truncf %15 : vector<16x256xf32> to vector<16x256xbf16>
    %c0_11 = arith.constant 0 : index
    %c0_12 = arith.constant 0 : index
    %17 = vector.load %arg6[%c0_11, %c0_12] : memref<16x256xbf16, #tpu.memory_space<vmem>>, vector<16x256xbf16>
    tpu.vector_store %arg6[%c0_11, %c0_12], %16 {strides = array<i32>} : memref<16x256xbf16, #tpu.memory_space<vmem>>, vector<16x256xbf16>,
    return
  }
  func.func @transform_0(%arg0: i32) -> (i32, i32) {
    %c0_i32 = arith.constant 0 : i32
    %c0_i32_0 = arith.constant 0 : i32
    return %arg0, %c0_i32 : i32, i32
  }
  func.func @transform_1(%arg0: i32) -> (i32, i32) {
    %c0_i32 = arith.constant 0 : i32
    %c0_i32_0 = arith.constant 0 : i32
    %c0_i32_1 = arith.constant 0 : i32
    return %c0_i32, %c0_i32_0 : i32, i32
  }
  func.func @transform_2(%arg0: i32) -> (i32, i32) {
    %c0_i32 = arith.constant 0 : i32
    %c0_i32_0 = arith.constant 0 : i32
    %c0_i32_1 = arith.constant 0 : i32
    return %c0_i32, %c0_i32_0 : i32, i32
  }
  func.func @transform_3(%arg0: i32) -> (i32, i32) {
    %c0_i32 = arith.constant 0 : i32
    %c0_i32_0 = arith.constant 0 : i32
    %c0_i32_1 = arith.constant 0 : i32
    return %c0_i32, %c0_i32_0 : i32, i32
  }
  func.func @transform_4(%arg0: i32) -> (i32, i32) {
    %c0_i32 = arith.constant 0 : i32
    %c0_i32_0 = arith.constant 0 : i32
    %c0_i32_1 = arith.constant 0 : i32
    return %c0_i32, %c0_i32_0 : i32, i32
  }
  func.func @transform_5(%arg0: i32) -> (i32, i32) {
    %c0_i32 = arith.constant 0 : i32
    %c0_i32_0 = arith.constant 0 : i32
    return %arg0, %c0_i32 : i32, i32
  }
}

module attributes {stable_mosaic.version = 11 : i64} {
  func.func @adapter_kernel(%arg0: i32, %arg1: memref<16x256xbf16, #tpu.memory_space<vmem>>, %arg2: memref<256x128xbf16, #tpu.memory_space<vmem>>, %arg3: memref<1x128xbf16, #tpu.memory_space<vmem>>, %arg4: memref<128x256xbf16, #tpu.memory_space<vmem>>, %arg5: memref<1x256xbf16, #tpu.memory_space<vmem>>, %arg6: memref<16x256xbf16, #tpu.memory_space<vmem>>) attributes {dimension_semantics = [#tpu.dimension_semantics<parallel>], iteration_bounds = array<i64: 1>, scalar_prefetch = 0 : i64, scratch_operands = 0 : i64, tpu.core_type = #tpu.core_type<tc>, window_params = [{transform_indices = @transform_0, window_bounds = array<i64: 16, 256>}, {pipeline_mode = #tpu.pipeline_mode<synchronous>, transform_indices = @transform_1, window_bounds = array<i64: 256, 128>}, {pipeline_mode = #tpu.pipeline_mode<synchronous>, transform_indices = @transform_2, window_bounds = array<i64: 1, 128>}, {pipeline_mode = #tpu.pipeline_mode<synchronous>, transform_indices = @transform_3, window_bounds = array<i64: 128, 256>}, {pipeline_mode = #tpu.pipeline_mode<synchronous>, transform_indices = @transform_4, window_bounds = array<i64: 1, 256>}, {transform_indices = @transform_5, window_bounds = array<i64: 16, 256>}]} {
    %c0 = arith.constant 0 : index
    %c0_0 = arith.constant 0 : index
    %0 = vector.load %arg1[%c0, %c0_0] : memref<16x256xbf16, #tpu.memory_space<vmem>>, vector<16x256xbf16>
    %c0_1 = arith.constant 0 : index
    %c0_2 = arith.constant 0 : index
    %1 = vector.load %arg2[%c0_1, %c0_2] : memref<256x128xbf16, #tpu.memory_space<vmem>>, vector<256x128xbf16>
    %cst = arith.constant dense<0.000000e+00> : vector<16x128xf32>
    %2 = tpu.matmul %0, %1, %cst {dimension_numbers = #tpu.dot_dimension_numbers<[1], [0], [0], [1], [0, 0, 1, 1], [], []>} : vector<16x256xbf16>, vector<256x128xbf16>, vector<16x128xf32> -> vector<16x128xf32>
    %c0_3 = arith.constant 0 : index
    %c0_4 = arith.constant 0 : index
    %3 = vector.load %arg3[%c0_3, %c0_4] : memref<1x128xbf16, #tpu.memory_space<vmem>>, vector<1x128xbf16>
    %4 = arith.extf %3 : vector<1x128xbf16> to vector<1x128xf32>
    %5 = vector.broadcast %4 : vector<1x128xf32> to vector<16x128xf32>
    %6 = arith.addf %2, %5 : vector<16x128xf32>
    %cst_5 = arith.constant 0.000000e+00 : f32
    %7 = vector.broadcast %cst_5 : f32 to vector<16x128xf32>
    %8 = arith.maximumf %6, %7 : vector<16x128xf32>
    %9 = arith.truncf %8 : vector<16x128xf32> to vector<16x128xbf16>
    %c0_6 = arith.constant 0 : index
    %c0_7 = arith.constant 0 : index
    %10 = vector.load %arg4[%c0_6, %c0_7] : memref<128x256xbf16, #tpu.memory_space<vmem>>, vector<128x256xbf16>
    %cst_8 = arith.constant dense<0.000000e+00> : vector<16x256xf32>
    %11 = tpu.matmul %9, %10, %cst_8 {dimension_numbers = #tpu.dot_dimension_numbers<[1], [0], [0], [1], [0, 0, 1, 1], [], []>} : vector<16x128xbf16>, vector<128x256xbf16>, vector<16x256xf32> -> vector<16x256xf32>
    %c0_9 = arith.constant 0 : index
    %c0_10 = arith.constant 0 : index
    %12 = vector.load %arg5[%c0_9, %c0_10] : memref<1x256xbf16, #tpu.memory_space<vmem>>, vector<1x256xbf16>
    %13 = arith.extf %12 : vector<1x256xbf16> to vector<1x256xf32>
    %14 = vector.broadcast %13 : vector<1x256xf32> to vector<16x256xf32>
    %15 = arith.addf %11, %14 : vector<16x256xf32>
    %16 = arith.truncf %15 : vector<16x256xf32> to vector<16x256xbf16>
    %c0_11 = arith.constant 0 : index
    %c0_12 = arith.constant 0 : index
    %17 = vector.load %arg6[%c0_11, %c0_12] : memref<16x256xbf16, #tpu.memory_space<vmem>>, vector<16x256xbf16>
    tpu.vector_store %arg6[%c0_11, %c0_12], %16 {strides = array<i32>} : memref<16x256xbf16, #tpu.memory_space<vmem>>, vector<16x256xbf16>,
    return
  }
  func.func @transform_0(%arg0: i32) -> (i32, i32) {
    %c0_i32 = arith.constant 0 : i32
    %c0_i32_0 = arith.constant 0 : i32
    return %arg0, %c0_i32 : i32, i32
  }
  func.func @transform_1(%arg0: i32) -> (i32, i32) {
    %c0_i32 = arith.constant 0 : i32
    %c0_i32_0 = arith.constant 0 : i32
    %c0_i32_1 = arith.constant 0 : i32
    return %c0_i32, %c0_i32_0 : i32, i32
  }
  func.func @transform_2(%arg0: i32) -> (i32, i32) {
    %c0_i32 = arith.constant 0 : i32
    %c0_i32_0 = arith.constant 0 : i32
    %c0_i32_1 = arith.constant 0 : i32
    return %c0_i32, %c0_i32_0 : i32, i32
  }
  func.func @transform_3(%arg0: i32) -> (i32, i32) {
    %c0_i32 = arith.constant 0 : i32
    %c0_i32_0 = arith.constant 0 : i32
    %c0_i32_1 = arith.constant 0 : i32
    return %c0_i32, %c0_i32_0 : i32, i32
  }
  func.func @transform_4(%arg0: i32) -> (i32, i32) {
    %c0_i32 = arith.constant 0 : i32
    %c0_i32_0 = arith.constant 0 : i32
    %c0_i32_1 = arith.constant 0 : i32
    return %c0_i32, %c0_i32_0 : i32, i32
  }
  func.func @transform_5(%arg0: i32) -> (i32, i32) {
    %c0_i32 = arith.constant 0 : i32
    %c0_i32_0 = arith.constant 0 : i32
    return %arg0, %c0_i32 : i32, i32
  }
}

</mosaic_0001>

<bundles_post_ra>
// kernel: tpu_custom_call.1
= control target key start
LH: loop header
LB: loop body
LE: loop exit
PB: predicated region body
PF: predicated region fallthrough
CT: control target
= control target key end

     0   :  { %10 = vsyncpa [#allocation3], 0  ;;  %s753_s0 = inlined_call_operand.hbm [shape: bf16[16,256], index: 0, kind: input, shape index: {}]   ;;  %s754_s1 = inlined_call_operand.hbm [shape: bf16[256,128], index: 1, kind: input, shape index: {}]   ;;  %s755_s2 = inlined_call_operand.vmem [shape: bf16[1,128], index: 2, kind: input, shape index: {}]   ;;  %s756_s3 = inlined_call_operand.hbm [shape: bf16[128,256], index: 3, kind: input, shape index: {}]   ;;  %s757_s4 = inlined_call_operand.vmem [shape: bf16[1,256], index: 4, kind: input, shape index: {}]   ;;  %s758_s5 = inlined_call_operand.hbm [shape: bf16[16,256], index: 5, kind: output, shape index: {}]  }
   0x1   :  { %11 = vsyncpa [#allocation6], 0 }
   0x2   :  { %12 = vsyncpa [#allocation4], 0  ;;  %s651_s18 = smov [#allocation5]   ;;  %s557_s22 = scalar_lea.hbm %s754_s1, 2048 }
   0x3   :  { %s30_s19 = sshll.u32 %s651_s18, 4  ;;  %p558_p0 = scmp.ne.s32.totalorder %s754_s1, %s557_s22  ;;  %s31_s19 = int_to_ptr.vmem [resolvable:$true] %s30_s19 }
   0x4   :  { %p561_p1 = scmp.lt.u32.totalorder %s557_s22, %s754_s1 }
   0x6   :  { %p563_p2 = pnand %p561_p1, %p558_p0 }
   0x8   :  { %566 = shalt.err (!%p563_p2)
}
   0x9   :  { %s567_s27 = scalar_lea.vmem %s31_s19, 2048  ;;  %p572_p4 = scmp.lt.s32.totalorder %s31_s19, %s31_s19 }
   0xa   :  { %p568_p3 = scmp.ne.s32.totalorder %s31_s19, %s567_s27  ;;  %p573_p5 = scmp.lt.s32.totalorder %s567_s27, %s567_s27 }
   0xc   :  { %p574_p6 = por %p573_p5, %p572_p4 }
   0xe   :  { %p575_p7 = pnand %p574_p6, %p568_p3 }
  0x10   :  { %578 = shalt.err (!%p575_p7)
}
  0x11   :  { %s652_s28 = smov 64   ;;  %s653_s29 = smov 4  }
  0x12   :  { %36 = dma.hbm_to_vmem [thread:$0]  %s754_s1, 2048, %s31_s19, [#allocation6], %s652_s28, %s652_s28, %s653_s29  }
  0x13   :  { %s654_s7 = smov [#allocation2]   ;;  %s579_s11 = scalar_lea.hbm %s753_s0, 256 }
  0x14   :  { %s18_s8 = sshll.u32 %s654_s7, 4  ;;  %p580_p8 = scmp.ne.s32.totalorder %s753_s0, %s579_s11  ;;  %s19_s8 = int_to_ptr.vmem [resolvable:$true] %s18_s8 }
  0x15   :  { %p583_p9 = scmp.lt.u32.totalorder %s579_s11, %s753_s0 }
  0x17   :  { %p585_p10 = pnand %p583_p9, %p580_p8 }
  0x19   :  { %588 = shalt.err (!%p585_p10)
}
  0x1a   :  { %s589_s16 = scalar_lea.vmem %s19_s8, 256  ;;  %p594_p12 = scmp.lt.s32.totalorder %s19_s8, %s19_s8 }
  0x1b   :  { %p590_p11 = scmp.ne.s32.totalorder %s19_s8, %s589_s16  ;;  %p595_p13 = scmp.lt.s32.totalorder %s589_s16, %s589_s16 }
  0x1d   :  { %p596_p0 = por %p595_p13, %p594_p12 }
  0x1f   :  { %p597_p1 = pnand %p596_p0, %p590_p11 }
  0x21   :  { %600 = shalt.err (!%p597_p1)
}
  0x22   :  { %s655_s1 = smov 128   ;;  %s656_s17 = smov 8  }
  0x23   :  { %24 = dma.hbm_to_vmem [thread:$0]  %s753_s0, 256, %s19_s8, [#allocation3], %s655_s1, %s655_s1, %s656_s17  }
  0x24   :  { %s657_s20 = smov [#allocation7]   ;;  %s601_s24 = scalar_lea.hbm %s756_s3, 2048 }
  0x25   :  { %s44_s21 = sshll.u32 %s657_s20, 4  ;;  %p602_p2 = scmp.ne.s32.totalorder %s756_s3, %s601_s24  ;;  %s45_s21 = int_to_ptr.vmem [resolvable:$true] %s44_s21 }
  0x26   :  { %p605_p3 = scmp.lt.u32.totalorder %s601_s24, %s756_s3 }
  0x28   :  { %p607_p4 = pnand %p605_p3, %p602_p2 }
  0x2a   :  { %610 = shalt.err (!%p607_p4)
}
  0x2b   :  { %s611_s29 = scalar_lea.vmem %s45_s21, 2048  ;;  %p616_p6 = scmp.lt.s32.totalorder %s45_s21, %s45_s21 }
  0x2c   :  { %p612_p5 = scmp.ne.s32.totalorder %s45_s21, %s611_s29  ;;  %p617_p7 = scmp.lt.s32.totalorder %s611_s29, %s611_s29 }
  0x2e   :  { %p618_p8 = por %p617_p7, %p616_p6 }
  0x30   :  { %p619_p9 = pnand %p618_p8, %p612_p5 }
  0x32   :  { %622 = shalt.err (!%p619_p9)
}
  0x33   :  { %50 = dma.hbm_to_vmem [thread:$0]  %s756_s3, 2048, %s45_s21, [#allocation6], %s655_s1, %s655_s1, %s656_s17  }
  0x34   :  { %645 = dma.done.wait [#allocation3], 256  }
  0x35   :  { %646 = vsyncadd [#allocation3], 4294967040 }
  0x36   :  { %647 = dma.done.wait [#allocation6], 4096  }
  0x37   :  { %648 = vsyncadd [#allocation6], 4294963200  ;;  %v514_v0 = vld [vmem:[#allocation5 + $0x40] sm:$0xff]   ;;  %v516_v2 = vld [vmem:[#allocation5 + $0x48] sm:$0xff]   ;;  %v658_v34 = vmov 0   ;;  %v99_v35 = vlaneseq }
  0x38   :  { %v515_v1 = vld [vmem:[#allocation5] sm:$0xff]   ;;  %483 = vmatprep.subr.bf16.mxu0 %v514_v0  ;;  %v517_v3 = vld [vmem:[#allocation5 + $0x8] sm:$0xff]   ;;  %v518_v4 = vld [vmem:[#allocation5 + $0x50] sm:$0xff]   ;;  %402 = vmatprep.mubr.bf16.mxu1 %v658_v34 }
  0x39   :  { %484 = vmatpush3.bf16.msra.mxu0 %v515_v1  ;;  %v519_v5 = vld [vmem:[#allocation5 + $0x10] sm:$0xff]   ;;  %v520_v6 = vld [vmem:[#allocation5 + $0x58] sm:$0xff]   ;;  %v522_v8 = vld [vmem:[#allocation5 + $0x60] sm:$0xff]   ;;  %v100_v36 = vshrl.u32 %v99_v35, 7 }
  0x3a   :  { %485 = vmatprep.subr.bf16.mxu0 %v516_v2  ;;  %v521_v7 = vld [vmem:[#allocation5 + $0x18] sm:$0xff]   ;;  %v523_v9 = vld [vmem:[#allocation5 + $0x20] sm:$0xff]   ;;  %v524_v10 = vld [vmem:[#allocation5 + $0x68] sm:$0xff]  }
  0x3b   :  { %v532_v11 = vld [vmem:[#allocation2 + $0x4] ss:$8 sps:$4 sm:$0xff]   ;;  %v533_v12 = vld [vmem:[#allocation7 + $0x4] ss:$8 sps:$4 sm:$0xff]   ;;  %v535_v13 = vld [vmem:[#allocation7] ss:$8 sps:$4 sm:$0xff]  }
  0x3c   :  { %v525_v14 = vld [vmem:[#allocation5 + $0x28] sm:$0xff]   ;;  %241 = vmatprep.mubr.bf16.mxu0 %v532_v11  ;;  %v536_v15 = vld [vmem:[#allocation7 + $0x14] ss:$8 sps:$4 sm:$0xff]   ;;  %370 = vmatprep.subr.bf16.mxu1 %v533_v12  ;;  %v538_v17 = vld [vmem:[#allocation7 + $0x10] ss:$8 sps:$4 sm:$0xff]   ;;  %v101_v39 = vsub.s32 0, %v100_v36 }
  0x3d   :  { %486 = vmatpush3.bf16.msra.mxu0 %v517_v3  ;;  %v526_v16 = vld [vmem:[#allocation5 + $0x70] sm:$0xff]   ;;  %371 = vmatpush1.bf16.msra.mxu1 %v535_v13  ;;  %v539_v19 = vld [vmem:[#allocation7 + $0x24] ss:$8 sps:$4 sm:$0xff]   ;;  %v528_v20 = vld [vmem:[#allocation5 + $0x78] sm:$0xff]   ;;  %v278_v54 = vsub.s32 2, %v100_v36 }
  0x3e   :  { %487 = vmatprep.subr.bf16.mxu0 %v518_v4  ;;  %v527_v18 = vld [vmem:[#allocation5 + $0x30] sm:$0xff]   ;;  %372 = vmatprep.subr.bf16.mxu1 %v536_v15  ;;  %v541_v21 = vld [vmem:[#allocation7 + $0x20] ss:$8 sps:$4 sm:$0xff]   ;;  %v529_v23 = vld [vmem:[#allocation5 + $0x38] sm:$0xff]  }
  0x3f   :  { %v542_v22 = vld [vmem:[#allocation7 + $0x34] ss:$8 sps:$4 sm:$0xff]   ;;  %v544_v24 = vld [vmem:[#allocation7 + $0x30] ss:$8 sps:$4 sm:$0xff]   ;;  %v545_v26 = vld [vmem:[#allocation7 + $0x44] ss:$8 sps:$4 sm:$0xff]  }
  0x40   :  { %v530_v25 = vld [vmem:[#allocation2] ss:$8 sps:$4 sm:$0xff]   ;;  %v547_v27 = vld [vmem:[#allocation7 + $0x40] ss:$8 sps:$4 sm:$0xff]   ;;  %v548_v28 = vld [vmem:[#allocation7 + $0x54] ss:$8 sps:$4 sm:$0xff]  }
  0x41   :  { %488 = vmatpush3.bf16.msra.mxu0 %v519_v5  ;;  %373 = vmatpush1.bf16.msra.mxu1 %v538_v17  ;;  %v550_v29 = vld [vmem:[#allocation7 + $0x50] ss:$8 sps:$4 sm:$0xff]   ;;  %v551_v30 = vld [vmem:[#allocation7 + $0x64] ss:$8 sps:$4 sm:$0xff]   ;;  %v553_v31 = vld [vmem:[#allocation7 + $0x60] ss:$8 sps:$4 sm:$0xff]  }
  0x42   :  { %489 = vmatprep.subr.bf16.mxu0 %v520_v6  ;;  %374 = vmatprep.subr.bf16.mxu1 %v539_v19  ;;  %v554_v32 = vld [vmem:[#allocation7 + $0x74] ss:$8 sps:$4 sm:$0xff]   ;;  %v556_v33 = vld [vmem:[#allocation7 + $0x70] ss:$8 sps:$4 sm:$0xff]  }
  0x43   :  { %v97_v37 = vld [vmem:[%s755_s2] sm:$0x1]  ;;  %s659_s2 = smov [#allocation8]  }
  0x44   :  { %v98_v38 = vunpack.c.l.bf16 %v97_v37  ;;  %v269_v52 = vld [vmem:[%s757_s4] sm:$0x3]  ;;  %s432_s9 = sshll.u32 %s659_s2, 4  ;;  %s433_s9 = int_to_ptr.vmem [resolvable:$true] %s432_s9 }
  0x45   :  { %490 = vmatpush3.bf16.msra.mxu0 %v521_v7  ;;  %375 = vmatpush1.bf16.msra.mxu1 %v541_v21  ;;  %v270_v53 = vunpack.c.l.bf16 %v269_v52  ;;  %s623_s4 = scalar_lea.vmem %s433_s9, 256  ;;  %p628_p11 = scmp.lt.s32.totalorder %s433_s9, %s433_s9 }
  0x46   :  { %491 = vmatprep.subr.bf16.mxu0 %v522_v8  ;;  %376 = vmatprep.subr.bf16.mxu1 %v542_v22  ;;  %v102_v41 = vrot.slane %v98_v38, %v101_v39  ;;  %p624_p10 = scmp.ne.s32.totalorder %s433_s9, %s623_s4  ;;  %p629_p12 = scmp.lt.s32.totalorder %s623_s4, %s623_s4 }
  0x47   :  { %v275_v55 = vrot.slane %v270_v53, %v101_v39  ;;  %v279_v56 = vrot.slane %v270_v53, %v278_v54 }
  0x48   :  { %p630_p13 = por %p629_p12, %p628_p11 }
  0x49   :  { %492 = vmatpush3.bf16.msra.mxu0 %v523_v9  ;;  %377 = vmatpush1.bf16.msra.mxu1 %v544_v24  ;;  %v285_v57 = vrot.slane %v275_v55, %v101_v39  ;;  %v289_v58 = vrot.slane %v279_v56, %v101_v39 }
  0x4a   :  { %493 = vmatprep.subr.bf16.mxu0 %v524_v10  ;;  %378 = vmatprep.subr.bf16.mxu1 %v545_v26  ;;  %p631_p0 = pnand %p630_p13, %p624_p10 }
  0x4d   :  { %494 = vmatpush3.bf16.msra.mxu0 %v525_v14  ;;  %379 = vmatpush1.bf16.msra.mxu1 %v547_v27 }
  0x4e   :  { %495 = vmatprep.subr.bf16.mxu0 %v526_v16  ;;  %380 = vmatprep.subr.bf16.mxu1 %v548_v28 }
  0x51   :  { %496 = vmatpush3.bf16.msra.mxu0 %v527_v18  ;;  %381 = vmatpush1.bf16.msra.mxu1 %v550_v29 }
  0x52   :  { %497 = vmatprep.subr.bf16.mxu0 %v528_v20  ;;  %382 = vmatprep.subr.bf16.mxu1 %v551_v30 }
  0x55   :  { %498 = vmatpush3.bf16.msra.mxu0 %v529_v23  ;;  %383 = vmatpush1.bf16.msra.mxu1 %v553_v31 }
  0x56   :  { %384 = vmatprep.subr.bf16.mxu1 %v554_v32 }
  0x58   :  { %242 = vmatmul.mubr.bf16.vlgmr.msra.gmra.mrb[0].mxu0 %v530_v25 }
  0x59   :  { %385 = vmatpush1.bf16.msra.mxu1 %v556_v33 }
 0x12b   :  { %v499_v40 = vpop.f32.mrb[0].mxu0 }
 0x12c   :  { %v500_v42 = vpop.f32.mrb[1].mxu0 }
 0x12d   :  { %v501_v43 = vadd.f32 %v500_v42, %v499_v40  ;;  %v502_v44 = vpop.f32.mrb[2].mxu0 }
 0x12e   :  { %v503_v45 = vpop.f32.mrb[3].mxu0 }
 0x12f   :  { %v244_v46 = vadd.f32 %v501_v43, %v102_v41  ;;  %v504_v47 = vadd.f32 %v503_v45, %v502_v44 }
 0x131   :  { %v247_v48 = vadd.f32 %v504_v47, %v102_v41  ;;  %v250_v49 = vmax.f32 %v244_v46, 0.0 }
 0x133   :  { %v251_v50 = vmax.f32 %v247_v48, 0.0 }
 0x135   :  { %v252_v51 = vpack.c.bf16 %v251_v50, %v250_v49 }
 0x137   :  { %403 = vmatmul.mubr.bf16.vlgmr.msra.gmra.mrb[0].mxu1 %v252_v51 }
 0x20a   :  { %v404_v59 = vpop.f32.mrb[0].mxu1 }
 0x20b   :  { %v405_v60 = vadd.f32 %v404_v59, %v285_v57  ;;  %v406_v61 = vpop.f32.mrb[1].mxu1 }
 0x20c   :  { %v407_v62 = vadd.f32 %v406_v61, %v289_v58  ;;  %v408_v63 = vpop.f32.mrb[2].mxu1 }
 0x20d   :  { %v409_v0 = vadd.f32 %v408_v63, %v285_v57  ;;  %v410_v1 = vpop.f32.mrb[3].mxu1 }
 0x20e   :  { %v481_v2 = vpack.c.bf16 %v407_v62, %v405_v60  ;;  %v411_v3 = vadd.f32 %v410_v1, %v289_v58 }
 0x210   :  { %425 = vst [vmem:[#allocation8] sm:$0xff] %v481_v2  ;;  %v482_v4 = vpack.c.bf16 %v411_v3, %v409_v0 }
 0x212   :  { %426 = vst [vmem:[#allocation8 + $0x8] sm:$0xff] %v482_v4 }
 0x213   :  { %634 = shalt.err (!%p631_p0)
}
 0x214   :  { %s635_s12 = scalar_lea.hbm %s758_s5, 256 }
 0x215   :  { %p636_p1 = scmp.ne.s32.totalorder %s758_s5, %s635_s12  ;;  %p639_p2 = scmp.lt.u32.totalorder %s635_s12, %s758_s5 }
 0x217   :  { %p641_p3 = pnand %p639_p2, %p636_p1 }
 0x219   :  { %644 = shalt.err (!%p641_p3)
}
 0x21a   :  { %438 = dma.vmem_to_hbm [thread:$0]  %s433_s9, 256, %s758_s5, [#allocation4], %s655_s1, %s655_s1, %s656_s17  }
 0x21b   :  { %649 = dma.done.wait [#allocation4], 256  }
 0x21c   :  { %650 = vsyncadd [#allocation4], 4294967040 }
 0x21d   :  { %442 = vsyncpa [#allocation3], 1 }
 0x21e   :  { %443 = vsyncpa [#allocation6], 1 }
 0x21f   :  { %444 = vsyncpa [#allocation4], 1 }

// kernel: tpu_custom_call.1
= control target key start
LH: loop header
LB: loop body
LE: loop exit
PB: predicated region body
PF: predicated region fallthrough
CT: control target
= control target key end

     0   :  { %10 = vsyncpa [#allocation3], 0  ;;  %s753_s0 = inlined_call_operand.hbm [shape: bf16[16,256], index: 0, kind: input, shape index: {}]   ;;  %s754_s1 = inlined_call_operand.hbm [shape: bf16[256,128], index: 1, kind: input, shape index: {}]   ;;  %s755_s2 = inlined_call_operand.vmem [shape: bf16[1,128], index: 2, kind: input, shape index: {}]   ;;  %s756_s3 = inlined_call_operand.hbm [shape: bf16[128,256], index: 3, kind: input, shape index: {}]   ;;  %s757_s4 = inlined_call_operand.vmem [shape: bf16[1,256], index: 4, kind: input, shape index: {}]   ;;  %s758_s5 = inlined_call_operand.hbm [shape: bf16[16,256], index: 5, kind: output, shape index: {}]  }
   0x1   :  { %11 = vsyncpa [#allocation6], 0 }
   0x2   :  { %12 = vsyncpa [#allocation4], 0  ;;  %s651_s18 = smov [#allocation5]   ;;  %s557_s22 = scalar_lea.hbm %s754_s1, 2048 }
   0x3   :  { %s30_s19 = sshll.u32 %s651_s18, 4  ;;  %p558_p0 = scmp.ne.s32.totalorder %s754_s1, %s557_s22  ;;  %s31_s19 = int_to_ptr.vmem [resolvable:$true] %s30_s19 }
   0x4   :  { %p561_p1 = scmp.lt.u32.totalorder %s557_s22, %s754_s1 }
   0x6   :  { %p563_p2 = pnand %p561_p1, %p558_p0 }
   0x8   :  { %566 = shalt.err (!%p563_p2)
}
   0x9   :  { %s567_s27 = scalar_lea.vmem %s31_s19, 2048  ;;  %p572_p4 = scmp.lt.s32.totalorder %s31_s19, %s31_s19 }
   0xa   :  { %p568_p3 = scmp.ne.s32.totalorder %s31_s19, %s567_s27  ;;  %p573_p5 = scmp.lt.s32.totalorder %s567_s27, %s567_s27 }
   0xc   :  { %p574_p6 = por %p573_p5, %p572_p4 }
   0xe   :  { %p575_p7 = pnand %p574_p6, %p568_p3 }
  0x10   :  { %578 = shalt.err (!%p575_p7)
}
  0x11   :  { %s652_s28 = smov 64   ;;  %s653_s29 = smov 4  }
  0x12   :  { %36 = dma.hbm_to_vmem [thread:$0]  %s754_s1, 2048, %s31_s19, [#allocation6], %s652_s28, %s652_s28, %s653_s29  }
  0x13   :  { %s654_s7 = smov [#allocation2]   ;;  %s579_s11 = scalar_lea.hbm %s753_s0, 256 }
  0x14   :  { %s18_s8 = sshll.u32 %s654_s7, 4  ;;  %p580_p8 = scmp.ne.s32.totalorder %s753_s0, %s579_s11  ;;  %s19_s8 = int_to_ptr.vmem [resolvable:$true] %s18_s8 }
  0x15   :  { %p583_p9 = scmp.lt.u32.totalorder %s579_s11, %s753_s0 }
  0x17   :  { %p585_p10 = pnand %p583_p9, %p580_p8 }
  0x19   :  { %588 = shalt.err (!%p585_p10)
}
  0x1a   :  { %s589_s16 = scalar_lea.vmem %s19_s8, 256  ;;  %p594_p12 = scmp.lt.s32.totalorder %s19_s8, %s19_s8 }
  0x1b   :  { %p590_p11 = scmp.ne.s32.totalorder %s19_s8, %s589_s16  ;;  %p595_p13 = scmp.lt.s32.totalorder %s589_s16, %s589_s16 }
  0x1d   :  { %p596_p0 = por %p595_p13, %p594_p12 }
  0x1f   :  { %p597_p1 = pnand %p596_p0, %p590_p11 }
  0x21   :  { %600 = shalt.err (!%p597_p1)
}
  0x22   :  { %s655_s1 = smov 128   ;;  %s656_s17 = smov 8  }
  0x23   :  { %24 = dma.hbm_to_vmem [thread:$0]  %s753_s0, 256, %s19_s8, [#allocation3], %s655_s1, %s655_s1, %s656_s17  }
  0x24   :  { %s657_s20 = smov [#allocation7]   ;;  %s601_s24 = scalar_lea.hbm %s756_s3, 2048 }
  0x25   :  { %s44_s21 = sshll.u32 %s657_s20, 4  ;;  %p602_p2 = scmp.ne.s32.totalorder %s756_s3, %s601_s24  ;;  %s45_s21 = int_to_ptr.vmem [resolvable:$true] %s44_s21 }
  0x26   :  { %p605_p3 = scmp.lt.u32.totalorder %s601_s24, %s756_s3 }
  0x28   :  { %p607_p4 = pnand %p605_p3, %p602_p2 }
  0x2a   :  { %610 = shalt.err (!%p607_p4)
}
  0x2b   :  { %s611_s29 = scalar_lea.vmem %s45_s21, 2048  ;;  %p616_p6 = scmp.lt.s32.totalorder %s45_s21, %s45_s21 }
  0x2c   :  { %p612_p5 = scmp.ne.s32.totalorder %s45_s21, %s611_s29  ;;  %p617_p7 = scmp.lt.s32.totalorder %s611_s29, %s611_s29 }
  0x2e   :  { %p618_p8 = por %p617_p7, %p616_p6 }
  0x30   :  { %p619_p9 = pnand %p618_p8, %p612_p5 }
  0x32   :  { %622 = shalt.err (!%p619_p9)
}
  0x33   :  { %50 = dma.hbm_to_vmem [thread:$0]  %s756_s3, 2048, %s45_s21, [#allocation6], %s655_s1, %s655_s1, %s656_s17  }
  0x34   :  { %645 = dma.done.wait [#allocation3], 256  }
  0x35   :  { %646 = vsyncadd [#allocation3], 4294967040 }
  0x36   :  { %647 = dma.done.wait [#allocation6], 4096  }
  0x37   :  { %648 = vsyncadd [#allocation6], 4294963200  ;;  %v514_v0 = vld [vmem:[#allocation5 + $0x40] sm:$0xff]   ;;  %v516_v2 = vld [vmem:[#allocation5 + $0x48] sm:$0xff]   ;;  %v658_v34 = vmov 0   ;;  %v99_v35 = vlaneseq }
  0x38   :  { %v515_v1 = vld [vmem:[#allocation5] sm:$0xff]   ;;  %483 = vmatprep.subr.bf16.mxu0 %v514_v0  ;;  %v517_v3 = vld [vmem:[#allocation5 + $0x8] sm:$0xff]   ;;  %v518_v4 = vld [vmem:[#allocation5 + $0x50] sm:$0xff]   ;;  %402 = vmatprep.mubr.bf16.mxu1 %v658_v34 }
  0x39   :  { %484 = vmatpush3.bf16.msra.mxu0 %v515_v1  ;;  %v519_v5 = vld [vmem:[#allocation5 + $0x10] sm:$0xff]   ;;  %v520_v6 = vld [vmem:[#allocation5 + $0x58] sm:$0xff]   ;;  %v522_v8 = vld [vmem:[#allocation5 + $0x60] sm:$0xff]   ;;  %v100_v36 = vshrl.u32 %v99_v35, 7 }
  0x3a   :  { %485 = vmatprep.subr.bf16.mxu0 %v516_v2  ;;  %v521_v7 = vld [vmem:[#allocation5 + $0x18] sm:$0xff]   ;;  %v523_v9 = vld [vmem:[#allocation5 + $0x20] sm:$0xff]   ;;  %v524_v10 = vld [vmem:[#allocation5 + $0x68] sm:$0xff]  }
  0x3b   :  { %v532_v11 = vld [vmem:[#allocation2 + $0x4] ss:$8 sps:$4 sm:$0xff]   ;;  %v533_v12 = vld [vmem:[#allocation7 + $0x4] ss:$8 sps:$4 sm:$0xff]   ;;  %v535_v13 = vld [vmem:[#allocation7] ss:$8 sps:$4 sm:$0xff]  }
  0x3c   :  { %v525_v14 = vld [vmem:[#allocation5 + $0x28] sm:$0xff]   ;;  %241 = vmatprep.mubr.bf16.mxu0 %v532_v11  ;;  %v536_v15 = vld [vmem:[#allocation7 + $0x14] ss:$8 sps:$4 sm:$0xff]   ;;  %370 = vmatprep.subr.bf16.mxu1 %v533_v12  ;;  %v538_v17 = vld [vmem:[#allocation7 + $0x10] ss:$8 sps:$4 sm:$0xff]   ;;  %v101_v39 = vsub.s32 0, %v100_v36 }
  0x3d   :  { %486 = vmatpush3.bf16.msra.mxu0 %v517_v3  ;;  %v526_v16 = vld [vmem:[#allocation5 + $0x70] sm:$0xff]   ;;  %371 = vmatpush1.bf16.msra.mxu1 %v535_v13  ;;  %v539_v19 = vld [vmem:[#allocation7 + $0x24] ss:$8 sps:$4 sm:$0xff]   ;;  %v528_v20 = vld [vmem:[#allocation5 + $0x78] sm:$0xff]   ;;  %v278_v54 = vsub.s32 2, %v100_v36 }
  0x3e   :  { %487 = vmatprep.subr.bf16.mxu0 %v518_v4  ;;  %v527_v18 = vld [vmem:[#allocation5 + $0x30] sm:$0xff]   ;;  %372 = vmatprep.subr.bf16.mxu1 %v536_v15  ;;  %v541_v21 = vld [vmem:[#allocation7 + $0x20] ss:$8 sps:$4 sm:$0xff]   ;;  %v529_v23 = vld [vmem:[#allocation5 + $0x38] sm:$0xff]  }
  0x3f   :  { %v542_v22 = vld [vmem:[#allocation7 + $0x34] ss:$8 sps:$4 sm:$0xff]   ;;  %v544_v24 = vld [vmem:[#allocation7 + $0x30] ss:$8 sps:$4 sm:$0xff]   ;;  %v545_v26 = vld [vmem:[#allocation7 + $0x44] ss:$8 sps:$4 sm:$0xff]  }
  0x40   :  { %v530_v25 = vld [vmem:[#allocation2] ss:$8 sps:$4 sm:$0xff]   ;;  %v547_v27 = vld [vmem:[#allocation7 + $0x40] ss:$8 sps:$4 sm:$0xff]   ;;  %v548_v28 = vld [vmem:[#allocation7 + $0x54] ss:$8 sps:$4 sm:$0xff]  }
  0x41   :  { %488 = vmatpush3.bf16.msra.mxu0 %v519_v5  ;;  %373 = vmatpush1.bf16.msra.mxu1 %v538_v17  ;;  %v550_v29 = vld [vmem:[#allocation7 + $0x50] ss:$8 sps:$4 sm:$0xff]   ;;  %v551_v30 = vld [vmem:[#allocation7 + $0x64] ss:$8 sps:$4 sm:$0xff]   ;;  %v553_v31 = vld [vmem:[#allocation7 + $0x60] ss:$8 sps:$4 sm:$0xff]  }
  0x42   :  { %489 = vmatprep.subr.bf16.mxu0 %v520_v6  ;;  %374 = vmatprep.subr.bf16.mxu1 %v539_v19  ;;  %v554_v32 = vld [vmem:[#allocation7 + $0x74] ss:$8 sps:$4 sm:$0xff]   ;;  %v556_v33 = vld [vmem:[#allocation7 + $0x70] ss:$8 sps:$4 sm:$0xff]  }
  0x43   :  { %v97_v37 = vld [vmem:[%s755_s2] sm:$0x1]  ;;  %s659_s2 = smov [#allocation8]  }
  0x44   :  { %v98_v38 = vunpack.c.l.bf16 %v97_v37  ;;  %v269_v52 = vld [vmem:[%s757_s4] sm:$0x3]  ;;  %s432_s9 = sshll.u32 %s659_s2, 4  ;;  %s433_s9 = int_to_ptr.vmem [resolvable:$true] %s432_s9 }
  0x45   :  { %490 = vmatpush3.bf16.msra.mxu0 %v521_v7  ;;  %375 = vmatpush1.bf16.msra.mxu1 %v541_v21  ;;  %v270_v53 = vunpack.c.l.bf16 %v269_v52  ;;  %s623_s4 = scalar_lea.vmem %s433_s9, 256  ;;  %p628_p11 = scmp.lt.s32.totalorder %s433_s9, %s433_s9 }
  0x46   :  { %491 = vmatprep.subr.bf16.mxu0 %v522_v8  ;;  %376 = vmatprep.subr.bf16.mxu1 %v542_v22  ;;  %v102_v41 = vrot.slane %v98_v38, %v101_v39  ;;  %p624_p10 = scmp.ne.s32.totalorder %s433_s9, %s623_s4  ;;  %p629_p12 = scmp.lt.s32.totalorder %s623_s4, %s623_s4 }
  0x47   :  { %v275_v55 = vrot.slane %v270_v53, %v101_v39  ;;  %v279_v56 = vrot.slane %v270_v53, %v278_v54 }
  0x48   :  { %p630_p13 = por %p629_p12, %p628_p11 }
  0x49   :  { %492 = vmatpush3.bf16.msra.mxu0 %v523_v9  ;;  %377 = vmatpush1.bf16.msra.mxu1 %v544_v24  ;;  %v285_v57 = vrot.slane %v275_v55, %v101_v39  ;;  %v289_v58 = vrot.slane %v279_v56, %v101_v39 }
  0x4a   :  { %493 = vmatprep.subr.bf16.mxu0 %v524_v10  ;;  %378 = vmatprep.subr.bf16.mxu1 %v545_v26  ;;  %p631_p0 = pnand %p630_p13, %p624_p10 }
  0x4d   :  { %494 = vmatpush3.bf16.msra.mxu0 %v525_v14  ;;  %379 = vmatpush1.bf16.msra.mxu1 %v547_v27 }
  0x4e   :  { %495 = vmatprep.subr.bf16.mxu0 %v526_v16  ;;  %380 = vmatprep.subr.bf16.mxu1 %v548_v28 }
  0x51   :  { %496 = vmatpush3.bf16.msra.mxu0 %v527_v18  ;;  %381 = vmatpush1.bf16.msra.mxu1 %v550_v29 }
  0x52   :  { %497 = vmatprep.subr.bf16.mxu0 %v528_v20  ;;  %382 = vmatprep.subr.bf16.mxu1 %v551_v30 }
  0x55   :  { %498 = vmatpush3.bf16.msra.mxu0 %v529_v23  ;;  %383 = vmatpush1.bf16.msra.mxu1 %v553_v31 }
  0x56   :  { %384 = vmatprep.subr.bf16.mxu1 %v554_v32 }
  0x58   :  { %242 = vmatmul.mubr.bf16.vlgmr.msra.gmra.mrb[0].mxu0 %v530_v25 }
  0x59   :  { %385 = vmatpush1.bf16.msra.mxu1 %v556_v33 }
 0x12b   :  { %v499_v40 = vpop.f32.mrb[0].mxu0 }
 0x12c   :  { %v500_v42 = vpop.f32.mrb[1].mxu0 }
 0x12d   :  { %v501_v43 = vadd.f32 %v500_v42, %v499_v40  ;;  %v502_v44 = vpop.f32.mrb[2].mxu0 }
 0x12e   :  { %v503_v45 = vpop.f32.mrb[3].mxu0 }
 0x12f   :  { %v244_v46 = vadd.f32 %v501_v43, %v102_v41  ;;  %v504_v47 = vadd.f32 %v503_v45, %v502_v44 }
 0x131   :  { %v247_v48 = vadd.f32 %v504_v47, %v102_v41  ;;  %v250_v49 = vmax.f32 %v244_v46, 0.0 }
 0x133   :  { %v251_v50 = vmax.f32 %v247_v48, 0.0 }
 0x135   :  { %v252_v51 = vpack.c.bf16 %v251_v50, %v250_v49 }
 0x137   :  { %403 = vmatmul.mubr.bf16.vlgmr.msra.gmra.mrb[0].mxu1 %v252_v51 }
 0x20a   :  { %v404_v59 = vpop.f32.mrb[0].mxu1 }
 0x20b   :  { %v405_v60 = vadd.f32 %v404_v59, %v285_v57  ;;  %v406_v61 = vpop.f32.mrb[1].mxu1 }
 0x20c   :  { %v407_v62 = vadd.f32 %v406_v61, %v289_v58  ;;  %v408_v63 = vpop.f32.mrb[2].mxu1 }
 0x20d   :  { %v409_v0 = vadd.f32 %v408_v63, %v285_v57  ;;  %v410_v1 = vpop.f32.mrb[3].mxu1 }
 0x20e   :  { %v481_v2 = vpack.c.bf16 %v407_v62, %v405_v60  ;;  %v411_v3 = vadd.f32 %v410_v1, %v289_v58 }
 0x210   :  { %425 = vst [vmem:[#allocation8] sm:$0xff] %v481_v2  ;;  %v482_v4 = vpack.c.bf16 %v411_v3, %v409_v0 }
 0x212   :  { %426 = vst [vmem:[#allocation8 + $0x8] sm:$0xff] %v482_v4 }
 0x213   :  { %634 = shalt.err (!%p631_p0)
}
 0x214   :  { %s635_s12 = scalar_lea.hbm %s758_s5, 256 }
 0x215   :  { %p636_p1 = scmp.ne.s32.totalorder %s758_s5, %s635_s12  ;;  %p639_p2 = scmp.lt.u32.totalorder %s635_s12, %s758_s5 }
 0x217   :  { %p641_p3 = pnand %p639_p2, %p636_p1 }
 0x219   :  { %644 = shalt.err (!%p641_p3)
}
 0x21a   :  { %438 = dma.vmem_to_hbm [thread:$0]  %s433_s9, 256, %s758_s5, [#allocation4], %s655_s1, %s655_s1, %s656_s17  }
 0x21b   :  { %649 = dma.done.wait [#allocation4], 256  }
 0x21c   :  { %650 = vsyncadd [#allocation4], 4294967040 }
 0x21d   :  { %442 = vsyncpa [#allocation3], 1 }
 0x21e   :  { %443 = vsyncpa [#allocation6], 1 }
 0x21f   :  { %444 = vsyncpa [#allocation4], 1 }

</bundles_post_ra>
